<compile_context>
chip_gen: v7x
topology: tpu7x:2x2x1
jax: 0.10.0
libtpu: 0.0.40
codegen_flags: <defaults>
</compile_context>

<pallas_src>
import functools

import jax
import jax.numpy as jnp
from jax.experimental import pallas as pl
from jax.experimental.pallas import tpu as pltpu


_SPLIT_MIN_ROWS = 256  # split M into >=2 tiles (v7x megacore) once each half >= this


def _round_up(x: int, m: int) -> int:
    return ((x + m - 1) // m) * m


def _mlp_fused_kernel(x_ref, *refs, num_layers, matmul_dtype):
    """h = relu(h @ W_l + b_l) for l = 0..num_layers-1, fully fused.

    refs = (w_0, b_0, w_1, b_1, ..., o_ref).  Grid = (cdiv(M, tm),).
    Weights arrive already in `matmul_dtype` (cast once in the wrapper);
    biases are f32.  Activations stay f32 between layers; only the matmul
    LHS is cast, so bf16 quantization error does not compound with depth.
    """
    o_ref = refs[-1]
    wb = refs[:-1]

    h = x_ref[...].astype(jnp.float32)
    for l in range(num_layers):  # static unroll over layers
        w = wb[2 * l][...]
        b = wb[2 * l + 1][...]
        lhs = h if matmul_dtype is None else h.astype(matmul_dtype)
        y = jnp.dot(lhs, w, preferred_element_type=jnp.float32)  # MXU, f32 acc
        h = jnp.maximum(y + b, 0.0)                               # bias + ReLU (f32)
        # TODO(synk): dropout omitted (inference-mode identity).

    o_ref[...] = h.astype(o_ref.dtype)


def mlp_encoder_forward(x, params, *, block_m=512, compute_dtype=jnp.bfloat16):
    """params: list of (W[in, out], b[1, out]) per layer.

    compute_dtype: dtype of the MXU operands (weights + matmul LHS).  Default
    bf16 (fast path on v6e/v7x, fine on v5e); None -> exact f32 matmul.
    Weights that already match compute_dtype are passed through uncast.
    """
    M, D_in = x.shape
    assert params, "need at least one layer"
    d_prev = D_in
    for w, b in params:
        assert w.shape[0] == d_prev and b.shape == (1, w.shape[1])
        d_prev = w.shape[1]
    D_out = d_prev
    num_layers = len(params)

    # Sublane granularity for the activation dtype (f32: 8, bf16: 16, 8-bit: 32).
    sub = {4: 8, 2: 16, 1: 32}.get(jnp.dtype(x.dtype).itemsize, 8)

    # M-tile selection: big tiles for HBM-roofline efficiency, >=2 tiles when
    # possible (v7x megacore), single full-extent block for tiny batches.
    if M > block_m:
        tm = _round_up(block_m, sub)
    elif M >= 2 * _SPLIT_MIN_ROWS:
        tm = _round_up(pl.cdiv(M, 2), sub)
    else:
        tm = M  # full-extent block: always legal, zero padding waste
    grid = (pl.cdiv(M, tm),)  # partial last block is masked by Pallas

    # Cast weights ONCE here (not per-tile inside the kernel); biases stay f32.
    target_wdtype = jnp.float32 if compute_dtype is None else compute_dtype
    in_specs = [pl.BlockSpec((tm, D_in), lambda i: (i, 0))]          # x tile
    flat_params = []
    for w, b in params:
        if w.dtype != target_wdtype:
            w = w.astype(target_wdtype)
        b = b.astype(jnp.float32)
        # Constant index_map -> DMA'd once, VMEM-resident across all M tiles.
        in_specs.append(pl.BlockSpec(w.shape, lambda i: (0, 0)))
        in_specs.append(pl.BlockSpec(b.shape, lambda i: (0, 0)))
        flat_params += [w, b]

    return pl.pallas_call(
        functools.partial(
            _mlp_fused_kernel, num_layers=num_layers, matmul_dtype=compute_dtype
        ),
        out_shape=jax.ShapeDtypeStruct((M, D_out), x.dtype),
        grid_spec=pltpu.PrefetchScalarGridSpec(
            num_scalar_prefetch=0,
            grid=grid,
            in_specs=in_specs,
            out_specs=pl.BlockSpec((tm, D_out), lambda i: (i, 0)),
        ),
        compiler_params=pltpu.CompilerParams(
            dimension_semantics=("parallel",),
        ),
    )(x, *flat_params)


class MLPEncoderPallas:
    """Mirror of MLPEncoder: num_layers stacked LinearLayer blocks."""

    def __init__(self, input_dim=128, output_dim=128, dropout=0.1, num_layers=1,
                 key=None, dtype=jnp.float32, compute_dtype=jnp.bfloat16,
                 block_m=512):
        del dropout  # TODO(synk): dropout is inference-mode identity here.
        if key is None:
            key = jax.random.PRNGKey(0)
        self.compute_dtype = compute_dtype
        self.block_m = block_m
        self.params = []  # master copies (param dtype), used for references
        in_dim = input_dim
        for _ in range(num_layers):
            key, kw, kb = jax.random.split(key, 3)
            bound = 1.0 / (in_dim ** 0.5)   # roughly torch Linear's uniform bound
            w = jax.random.uniform(kw, (in_dim, output_dim), dtype,
                                   minval=-bound, maxval=bound)
            b = jax.random.uniform(kb, (1, output_dim), dtype,
                                   minval=-bound, maxval=bound)
            self.params.append((w, b))
            in_dim = output_dim
        # Pre-cast once so the per-call path does no weight casts at all.
        tgt = jnp.float32 if compute_dtype is None else compute_dtype
        self.run_params = [(w.astype(tgt), b.astype(jnp.float32))
                           for w, b in self.params]

    def __call__(self, x):
        return mlp_encoder_forward(x, self.run_params, block_m=self.block_m,
                                   compute_dtype=self.compute_dtype)


if __name__ == "__main__":
    key = jax.random.PRNGKey(0)
    kx, kx2, kp = jax.random.split(key, 3)

    batch = 8
    input_dim = 128
    output_dim = 128
    num_layers = 2

    x = jax.random.normal(kx, (batch, input_dim), dtype=jnp.float32)
    model = MLPEncoderPallas(input_dim=input_dim, output_dim=output_dim,
                             dropout=0.1, num_layers=num_layers, key=kp)

    # pure-JAX references
    def ref_f32(xx):
        h = xx
        for w, b in model.params:
            h = jnp.maximum(jnp.dot(h, w, precision="highest") + b, 0.0)
        return h

    def ref_bf16(xx):
        h = xx.astype(jnp.float32)
        for w, b in model.params:
            y = jnp.dot(h.astype(jnp.bfloat16), w.astype(jnp.bfloat16),
                        preferred_element_type=jnp.float32)
            h = jnp.maximum(y + b, 0.0)
        return h

    # --- default bf16-MXU path ------------------------------------------------
    out = jax.block_until_ready(model(x))
    assert out.shape == (batch, output_dim)
    assert jnp.allclose(out, ref_bf16(x), atol=2e-2, rtol=2e-2)
    assert jnp.allclose(out, ref_f32(x), atol=5e-2, rtol=5e-2)

    # --- exact f32 path (opt-in) ------------------------------------------------
    out_f32 = jax.block_until_ready(
        mlp_encoder_forward(x, model.params, compute_dtype=None))
    assert jnp.allclose(out_f32, ref_f32(x), atol=1e-5, rtol=1e-5)

    # --- non-8-aligned tiny batch (single full-extent block, no padding) --------
    out_odd = jax.block_until_ready(
        mlp_encoder_forward(x[:5], model.params, compute_dtype=None))
    assert out_odd.shape == (5, output_dim)
    assert jnp.allclose(out_odd, ref_f32(x)[:5], atol=1e-5, rtol=1e-5)

    # --- multi-tile grid with a partial (masked) last block ---------------------
    xb = jax.random.normal(kx2, (40, input_dim), dtype=jnp.float32)
    out_b = jax.block_until_ready(
        mlp_encoder_forward(xb, model.params, compute_dtype=None, block_m=16))
    assert out_b.shape == (40, output_dim)
    assert jnp.allclose(out_b, ref_f32(xb), atol=1e-5, rtol=1e-5)

    # --- mid-size batch: splits into 2 tiles (v7x megacore path) ----------------
    xs = jax.random.normal(kx2, (512, input_dim), dtype=jnp.float32)
    out_s = jax.block_until_ready(
        mlp_encoder_forward(xs, model.params, compute_dtype=None))
    assert jnp.allclose(out_s, ref_f32(xs), atol=1e-5, rtol=1e-5)

    # --- bf16 I/O path (halves activation HBM traffic) --------------------------
    x_bf = x.astype(jnp.bfloat16)
    out_bf = jax.block_until_ready(model(x_bf))
    assert out_bf.dtype == jnp.bfloat16
    assert jnp.allclose(out_bf.astype(jnp.float32),
                        ref_bf16(x_bf), atol=5e-2, rtol=5e-2)

    print("KERNEL_OK")
</pallas_src>

<mosaic_0001>
module attributes {stable_mosaic.version = 11 : i64} {
  func.func @_mlp_fused_kernel(%arg0: i32, %arg1: memref<8x128xf32, #tpu.memory_space<vmem>>, %arg2: memref<128x128xbf16, #tpu.memory_space<vmem>>, %arg3: memref<1x128xf32, #tpu.memory_space<vmem>>, %arg4: memref<128x128xbf16, #tpu.memory_space<vmem>>, %arg5: memref<1x128xf32, #tpu.memory_space<vmem>>, %arg6: memref<8x128xf32, #tpu.memory_space<vmem>>) attributes {dimension_semantics = [#tpu.dimension_semantics<parallel>], iteration_bounds = array<i64: 1>, scalar_prefetch = 0 : i64, scratch_operands = 0 : i64, tpu.core_type = #tpu.core_type<tc>, window_params = [{transform_indices = @transform_0, window_bounds = array<i64: 8, 128>}, {pipeline_mode = #tpu.pipeline_mode<synchronous>, transform_indices = @transform_1, window_bounds = array<i64: 128, 128>}, {pipeline_mode = #tpu.pipeline_mode<synchronous>, transform_indices = @transform_2, window_bounds = array<i64: 1, 128>}, {pipeline_mode = #tpu.pipeline_mode<synchronous>, transform_indices = @transform_3, window_bounds = array<i64: 128, 128>}, {pipeline_mode = #tpu.pipeline_mode<synchronous>, transform_indices = @transform_4, window_bounds = array<i64: 1, 128>}, {transform_indices = @transform_5, window_bounds = array<i64: 8, 128>}]} {
    %c0 = arith.constant 0 : index
    %c0_0 = arith.constant 0 : index
    %0 = vector.load %arg1[%c0, %c0_0] : memref<8x128xf32, #tpu.memory_space<vmem>>, vector<8x128xf32>
    %c0_1 = arith.constant 0 : index
    %c0_2 = arith.constant 0 : index
    %1 = vector.load %arg2[%c0_1, %c0_2] : memref<128x128xbf16, #tpu.memory_space<vmem>>, vector<128x128xbf16>
    %c0_3 = arith.constant 0 : index
    %c0_4 = arith.constant 0 : index
    %2 = vector.load %arg3[%c0_3, %c0_4] : memref<1x128xf32, #tpu.memory_space<vmem>>, vector<1x128xf32>
    %3 = arith.truncf %0 : vector<8x128xf32> to vector<8x128xbf16>
    %cst = arith.constant dense<0.000000e+00> : vector<8x128xf32>
    %4 = tpu.matmul %3, %1, %cst {dimension_numbers = #tpu.dot_dimension_numbers<[1], [0], [0], [1], [0, 0, 1, 1], [], []>} : vector<8x128xbf16>, vector<128x128xbf16>, vector<8x128xf32> -> vector<8x128xf32>
    %5 = vector.broadcast %2 : vector<1x128xf32> to vector<8x128xf32>
    %6 = arith.addf %4, %5 : vector<8x128xf32>
    %cst_5 = arith.constant 0.000000e+00 : f32
    %7 = vector.broadcast %cst_5 : f32 to vector<8x128xf32>
    %8 = arith.maximumf %6, %7 : vector<8x128xf32>
    %c0_6 = arith.constant 0 : index
    %c0_7 = arith.constant 0 : index
    %9 = vector.load %arg4[%c0_6, %c0_7] : memref<128x128xbf16, #tpu.memory_space<vmem>>, vector<128x128xbf16>
    %c0_8 = arith.constant 0 : index
    %c0_9 = arith.constant 0 : index
    %10 = vector.load %arg5[%c0_8, %c0_9] : memref<1x128xf32, #tpu.memory_space<vmem>>, vector<1x128xf32>
    %11 = arith.truncf %8 : vector<8x128xf32> to vector<8x128xbf16>
    %cst_10 = arith.constant dense<0.000000e+00> : vector<8x128xf32>
    %12 = tpu.matmul %11, %9, %cst_10 {dimension_numbers = #tpu.dot_dimension_numbers<[1], [0], [0], [1], [0, 0, 1, 1], [], []>} : vector<8x128xbf16>, vector<128x128xbf16>, vector<8x128xf32> -> vector<8x128xf32>
    %13 = vector.broadcast %10 : vector<1x128xf32> to vector<8x128xf32>
    %14 = arith.addf %12, %13 : vector<8x128xf32>
    %cst_11 = arith.constant 0.000000e+00 : f32
    %15 = vector.broadcast %cst_11 : f32 to vector<8x128xf32>
    %16 = arith.maximumf %14, %15 : vector<8x128xf32>
    %c0_12 = arith.constant 0 : index
    %c0_13 = arith.constant 0 : index
    %17 = vector.load %arg6[%c0_12, %c0_13] : memref<8x128xf32, #tpu.memory_space<vmem>>, vector<8x128xf32>
    tpu.vector_store %arg6[%c0_12, %c0_13], %16 {strides = array<i32>} : memref<8x128xf32, #tpu.memory_space<vmem>>, vector<8x128xf32>,
    return
  }
  func.func @transform_0(%arg0: i32) -> (i32, i32) {
    %c0_i32 = arith.constant 0 : i32
    %c0_i32_0 = arith.constant 0 : i32
    return %arg0, %c0_i32 : i32, i32
  }
  func.func @transform_1(%arg0: i32) -> (i32, i32) {
    %c0_i32 = arith.constant 0 : i32
    %c0_i32_0 = arith.constant 0 : i32
    %c0_i32_1 = arith.constant 0 : i32
    return %c0_i32, %c0_i32_0 : i32, i32
  }
  func.func @transform_2(%arg0: i32) -> (i32, i32) {
    %c0_i32 = arith.constant 0 : i32
    %c0_i32_0 = arith.constant 0 : i32
    %c0_i32_1 = arith.constant 0 : i32
    return %c0_i32, %c0_i32_0 : i32, i32
  }
  func.func @transform_3(%arg0: i32) -> (i32, i32) {
    %c0_i32 = arith.constant 0 : i32
    %c0_i32_0 = arith.constant 0 : i32
    %c0_i32_1 = arith.constant 0 : i32
    return %c0_i32, %c0_i32_0 : i32, i32
  }
  func.func @transform_4(%arg0: i32) -> (i32, i32) {
    %c0_i32 = arith.constant 0 : i32
    %c0_i32_0 = arith.constant 0 : i32
    %c0_i32_1 = arith.constant 0 : i32
    return %c0_i32, %c0_i32_0 : i32, i32
  }
  func.func @transform_5(%arg0: i32) -> (i32, i32) {
    %c0_i32 = arith.constant 0 : i32
    %c0_i32_0 = arith.constant 0 : i32
    return %arg0, %c0_i32 : i32, i32
  }
}

</mosaic_0001>

<bundles_post_ra>
// kernel: tpu_custom_call.1
= control target key start
LH: loop header
LB: loop body
LE: loop exit
PB: predicated region body
PF: predicated region fallthrough
CT: control target
= control target key end

     0   :  { %10 = vsyncpa [#allocation3], 0  ;;  %s597_s0 = inlined_call_operand.hbm [shape: f32[8,128], index: 0, kind: input, shape index: {}]   ;;  %s598_s1 = inlined_call_operand.hbm [shape: bf16[128,128], index: 1, kind: input, shape index: {}]   ;;  %s599_s2 = inlined_call_operand.vmem [shape: f32[1,128], index: 2, kind: input, shape index: {}]   ;;  %s600_s3 = inlined_call_operand.hbm [shape: bf16[128,128], index: 3, kind: input, shape index: {}]   ;;  %s601_s4 = inlined_call_operand.vmem [shape: f32[1,128], index: 4, kind: input, shape index: {}]   ;;  %s602_s5 = inlined_call_operand.hbm [shape: f32[8,128], index: 5, kind: output, shape index: {}]  }
   0x1   :  { %11 = vsyncpa [#allocation6], 0 }
   0x2   :  { %12 = vsyncpa [#allocation4], 0  ;;  %s499_s18 = smov [#allocation5]   ;;  %s405_s22 = scalar_lea.hbm %s598_s1, 1024 }
   0x3   :  { %s28_s19 = sshll.u32 %s499_s18, 4  ;;  %p406_p0 = scmp.ne.s32.totalorder %s598_s1, %s405_s22  ;;  %s29_s19 = int_to_ptr.vmem [resolvable:$true] %s28_s19 }
   0x4   :  { %p409_p1 = scmp.lt.u32.totalorder %s405_s22, %s598_s1 }
   0x6   :  { %p411_p2 = pnand %p409_p1, %p406_p0 }
   0x8   :  { %414 = shalt.err (!%p411_p2)
}
   0x9   :  { %s415_s27 = scalar_lea.vmem %s29_s19, 1024  ;;  %p420_p4 = scmp.lt.s32.totalorder %s29_s19, %s29_s19 }
   0xa   :  { %p416_p3 = scmp.ne.s32.totalorder %s29_s19, %s415_s27  ;;  %p421_p5 = scmp.lt.s32.totalorder %s415_s27, %s415_s27 }
   0xc   :  { %p422_p6 = por %p421_p5, %p420_p4 }
   0xe   :  { %p423_p7 = pnand %p422_p6, %p416_p3 }
  0x10   :  { %426 = shalt.err (!%p423_p7)
}
  0x11   :  { %s500_s28 = smov 64   ;;  %s501_s29 = smov 4  }
  0x12   :  { %34 = dma.hbm_to_vmem [thread:$0]  %s598_s1, 1024, %s29_s19, [#allocation6], %s500_s28, %s500_s28, %s501_s29  }
  0x13   :  { %s502_s7 = smov [#allocation2]   ;;  %s503_s9 = smov [#allocation7]  }
  0x14   :  { %s19_s8 = sshll.u32 %s502_s7, 4  ;;  %s42_s10 = sshll.u32 %s503_s9, 4  ;;  %s20_s8 = int_to_ptr.vmem [resolvable:$true] %s19_s8  ;;  %s43_s10 = int_to_ptr.vmem [resolvable:$true] %s42_s10 }
  0x15   :  { %s427_s13 = scalar_lea.hbm %s597_s0, 128 }
  0x16   :  { %p428_p8 = scmp.ne.s32.totalorder %s597_s0, %s427_s13  ;;  %p431_p9 = scmp.lt.u32.totalorder %s427_s13, %s597_s0 }
  0x18   :  { %p433_p10 = pnand %p431_p9, %p428_p8 }
  0x1a   :  { %436 = shalt.err (!%p433_p10)
}
  0x1b   :  { %s437_s1 = scalar_lea.vmem %s20_s8, 128  ;;  %p442_p12 = scmp.lt.s32.totalorder %s20_s8, %s20_s8 }
  0x1c   :  { %p438_p11 = scmp.ne.s32.totalorder %s20_s8, %s437_s1  ;;  %p443_p13 = scmp.lt.s32.totalorder %s437_s1, %s437_s1 }
  0x1e   :  { %p444_p0 = por %p443_p13, %p442_p12 }
  0x20   :  { %p445_p1 = pnand %p444_p0, %p438_p11 }
  0x22   :  { %448 = shalt.err (!%p445_p1)
}
  0x23   :  { %22 = dma.hbm_to_vmem [thread:$0]  %s597_s0, 128, %s20_s8, [#allocation3]  }
  0x24   :  { %s449_s22 = scalar_lea.hbm %s600_s3, 1024 }
  0x25   :  { %p450_p2 = scmp.ne.s32.totalorder %s600_s3, %s449_s22  ;;  %p453_p3 = scmp.lt.u32.totalorder %s449_s22, %s600_s3 }
  0x27   :  { %p455_p4 = pnand %p453_p3, %p450_p2 }
  0x29   :  { %458 = shalt.err (!%p455_p4)
}
  0x2a   :  { %s459_s27 = scalar_lea.vmem %s43_s10, 1024  ;;  %p464_p6 = scmp.lt.s32.totalorder %s43_s10, %s43_s10 }
  0x2b   :  { %p460_p5 = scmp.ne.s32.totalorder %s43_s10, %s459_s27  ;;  %p465_p7 = scmp.lt.s32.totalorder %s459_s27, %s459_s27 }
  0x2d   :  { %p466_p8 = por %p465_p7, %p464_p6 }
  0x2f   :  { %p467_p9 = pnand %p466_p8, %p460_p5 }
  0x31   :  { %470 = shalt.err (!%p467_p9)
}
  0x32   :  { %48 = dma.hbm_to_vmem [thread:$0]  %s600_s3, 1024, %s43_s10, [#allocation6], %s500_s28, %s500_s28, %s501_s29  }
  0x33   :  { %493 = dma.done.wait [#allocation3], 128  }
  0x34   :  { %494 = vsyncadd [#allocation3], 4294967168 }
  0x35   :  { %495 = dma.done.wait [#allocation6], 2048  }
  0x36   :  { %496 = vsyncadd [#allocation6], 4294965248  ;;  %v504_v0 = vmov 0.0   ;;  %vm505_vm0 = vmmov 0   ;;  %v389_v1 = vld [vmem:[#allocation5] sm:$0xff]   ;;  %v390_v2 = vld [vmem:[#allocation5 + $0x8] sm:$0xff]  }
  0x37   :  { %341 = vmatprep.subr.bf16.mxu0 %v504_v0  ;;  %357 = vmatprep.mubr.msk.bf16.mxu0 %vm505_vm0, %v504_v0  ;;  %v391_v3 = vld [vmem:[#allocation5 + $0x10] sm:$0xff]   ;;  %v397_v4 = vld [vmem:[#allocation7] sm:$0xff]   ;;  %v392_v5 = vld [vmem:[#allocation5 + $0x18] sm:$0xff]   ;;  %s506_s7 = smov [#allocation8]  }
  0x38   :  { %361 = vmatprep.subr.bf16.mxu1 %v504_v0  ;;  %377 = vmatprep.mubr.msk.bf16.mxu1 %vm505_vm0, %v504_v0  ;;  %v398_v6 = vld [vmem:[#allocation7 + $0x8] sm:$0xff]   ;;  %v393_v7 = vld [vmem:[#allocation5 + $0x20] sm:$0xff]   ;;  %v399_v8 = vld [vmem:[#allocation7 + $0x10] sm:$0xff]   ;;  %s295_s8 = sshll.u32 %s506_s7, 4  ;;  %s296_s8 = int_to_ptr.vmem [resolvable:$true] %s295_s8 }
  0x39   :  { %342 = vmatpush3.bf16.msra.mxu0 %v389_v1  ;;  %362 = vmatpush3.bf16.msra.mxu1 %v397_v4  ;;  %v394_v9 = vld [vmem:[#allocation5 + $0x28] sm:$0xff]   ;;  %v400_v10 = vld [vmem:[#allocation7 + $0x18] sm:$0xff]   ;;  %v395_v11 = vld [vmem:[#allocation5 + $0x30] sm:$0xff]   ;;  %p476_p11 = scmp.lt.s32.totalorder %s296_s8, %s296_s8 }
  0x3a   :  { %343 = vmatprep.subr.bf16.mxu0 %v504_v0  ;;  %363 = vmatprep.subr.bf16.mxu1 %v504_v0  ;;  %v401_v12 = vld [vmem:[#allocation7 + $0x20] sm:$0xff]   ;;  %v396_v13 = vld [vmem:[#allocation5 + $0x38] sm:$0xff]   ;;  %v402_v15 = vld [vmem:[#allocation7 + $0x28] sm:$0xff]  }
  0x3b   :  { %v61_v14 = vld [vmem:[#allocation2] sm:$0xff]  ;;  %v403_v17 = vld [vmem:[#allocation7 + $0x30] sm:$0xff]  }
  0x3c   :  { %v79_v16 = vpack.c.bf16 %v61_v14, %v61_v14  ;;  %v404_v18 = vld [vmem:[#allocation7 + $0x38] sm:$0xff]  }
  0x3d   :  { %344 = vmatpush3.bf16.msra.mxu0 %v390_v2  ;;  %364 = vmatpush3.bf16.msra.mxu1 %v398_v6  ;;  %v305_v19 = vld [vmem:[%s599_s2] ss:$0 sm:$0xff]  ;;  %s471_s2 = scalar_lea.vmem %s296_s8, 128 }
  0x3e   :  { %345 = vmatprep.subr.bf16.mxu0 %v504_v0  ;;  %365 = vmatprep.subr.bf16.mxu1 %v504_v0  ;;  %v314_v27 = vld [vmem:[%s601_s4] ss:$0 sm:$0xff]  ;;  %p472_p10 = scmp.ne.s32.totalorder %s296_s8, %s471_s2  ;;  %p477_p12 = scmp.lt.s32.totalorder %s471_s2, %s471_s2 }
  0x40   :  { %p478_p13 = por %p477_p12, %p476_p11 }
  0x41   :  { %346 = vmatpush3.bf16.msra.mxu0 %v391_v3  ;;  %366 = vmatpush3.bf16.msra.mxu1 %v399_v8 }
  0x42   :  { %347 = vmatprep.subr.bf16.mxu0 %v504_v0  ;;  %367 = vmatprep.subr.bf16.mxu1 %v504_v0  ;;  %p479_p0 = pnand %p478_p13, %p472_p10 }
  0x45   :  { %348 = vmatpush3.bf16.msra.mxu0 %v392_v5  ;;  %368 = vmatpush3.bf16.msra.mxu1 %v400_v10 }
  0x46   :  { %349 = vmatprep.subr.bf16.mxu0 %v504_v0  ;;  %369 = vmatprep.subr.bf16.mxu1 %v504_v0 }
  0x49   :  { %350 = vmatpush3.bf16.msra.mxu0 %v393_v7  ;;  %370 = vmatpush3.bf16.msra.mxu1 %v401_v12 }
  0x4a   :  { %351 = vmatprep.subr.bf16.mxu0 %v504_v0  ;;  %371 = vmatprep.subr.bf16.mxu1 %v504_v0 }
  0x4d   :  { %352 = vmatpush3.bf16.msra.mxu0 %v394_v9  ;;  %372 = vmatpush3.bf16.msra.mxu1 %v402_v15 }
  0x4e   :  { %353 = vmatprep.subr.bf16.mxu0 %v504_v0  ;;  %373 = vmatprep.subr.bf16.mxu1 %v504_v0 }
  0x51   :  { %354 = vmatpush3.bf16.msra.mxu0 %v395_v11  ;;  %374 = vmatpush3.bf16.msra.mxu1 %v403_v17 }
  0x52   :  { %355 = vmatprep.subr.bf16.mxu0 %v504_v0  ;;  %375 = vmatprep.subr.bf16.mxu1 %v504_v0 }
  0x55   :  { %356 = vmatpush3.bf16.msra.mxu0 %v396_v13  ;;  %376 = vmatpush3.bf16.msra.mxu1 %v404_v18 }
  0x58   :  { %358 = vmatmul.mubr.bf16.vlgmr.msra.gmra.mrb[0].mxu0 %v79_v16 }
 0x12b   :  { %v168_v20 = vpop.f32.mrb[0].mxu0 }
 0x12c   :  { %v169_v21 = vadd.f32 %v305_v19, %v168_v20  ;;  %v359_v22 = vpop.f32.mrb[1].mxu0 }
 0x12d   :  { %v171_v23 = vpop.f32.mrb[2].mxu0 }
 0x12e   :  { %v174_v24 = vmax.f32 %v169_v21, 0.0  ;;  %v360_v25 = vpop.f32.mrb[3].mxu0 }
 0x130   :  { %v192_v26 = vpack.c.bf16 %v174_v24, %v174_v24 }
 0x132   :  { %378 = vmatmul.mubr.bf16.vlgmr.msra.gmra.mrb[0].mxu1 %v192_v26 }
 0x205   :  { %v281_v28 = vpop.f32.mrb[0].mxu1 }
 0x206   :  { %v282_v29 = vadd.f32 %v314_v27, %v281_v28  ;;  %v379_v30 = vpop.f32.mrb[1].mxu1 }
 0x207   :  { %v284_v31 = vpop.f32.mrb[2].mxu1 }
 0x208   :  { %v287_v32 = vmax.f32 %v282_v29, 0.0  ;;  %v380_v33 = vpop.f32.mrb[3].mxu1 }
 0x20a   :  { %288 = vst [vmem:[#allocation8] sm:$0xff] %v287_v32 }
 0x20b   :  { %482 = shalt.err (!%p479_p0)
}
 0x20c   :  { %s483_s4 = scalar_lea.hbm %s602_s5, 128 }
 0x20d   :  { %p484_p1 = scmp.ne.s32.totalorder %s602_s5, %s483_s4  ;;  %p487_p2 = scmp.lt.u32.totalorder %s483_s4, %s602_s5 }
 0x20f   :  { %p489_p3 = pnand %p487_p2, %p484_p1 }
 0x211   :  { %492 = shalt.err (!%p489_p3)
}
 0x212   :  { %298 = dma.vmem_to_hbm [thread:$0]  %s296_s8, 128, %s602_s5, [#allocation4]  }
 0x213   :  { %497 = dma.done.wait [#allocation4], 128  }
 0x214   :  { %498 = vsyncadd [#allocation4], 4294967168 }
 0x215   :  { %302 = vsyncpa [#allocation3], 1 }
 0x216   :  { %303 = vsyncpa [#allocation6], 1 }
 0x217   :  { %304 = vsyncpa [#allocation4], 1 }

</bundles_post_ra>
